<compile_context>
chip_gen: v7x
topology: tpu7x:2x2x1
jax: 0.10.0
libtpu: 0.0.40
codegen_flags: <defaults>
</compile_context>

<pallas_src>
import functools

import jax
import jax.numpy as jnp
from jax.experimental import pallas as pl
from jax.experimental.pallas import tpu as pltpu

# ----------------------------- problem sizes --------------------------------
B = 8          # batch
S = 8          # sequence length
H = 32         # hidden size of the synthetic p_model
N_ITEMS = 128  # number of items (lane-dense output axis)
K = 10         # number of sampled times (k=10 in the PyTorch module)
HP = H + 8     # augmented hidden width (time value occupies column H)
ROWS = (K + 1) * B  # 88 logit rows: K sampled-time blocks + 1 target-time block


# ------------------------------ Pallas kernel --------------------------------
def mll_kernel(item_emb_ref, w_ref, tpack_ref, ints_ref, out_ref, *, k, s):
    """Fused encoder + maximum-log-likelihood loss.

    item_emb_ref : (N, HP)        f32  item embeddings, cols H..HP-1 zero
    w_ref        : (HP, N)        f32  rows 0..H-1 = item weights, row H = time_w,
                                        rows H+1..HP-1 = zero
    tpack_ref    : (2B+ROWS, HP)  f32  rows [0,B)   cols [0,S): time_interval_seq
                                        row  B       : interval_w (padded to HP)
                                        rows [2B,..) : col H = sampled/target time
    ints_ref     : (3B, S)        i32  rows [0,B): item_seq; [B,2B) col0: seq_len;
                                        [2B,3B) col0: target_id
    out_ref      : (1, 1)         f32  SMEM scalar loss
    """
    bsz = ints_ref.shape[0] // 3
    n_items, hp = item_emb_ref.shape
    n = w_ref.shape[1]

    ids = ints_ref[0:bsz, :]                          # (B, S) i32
    lens_i = ints_ref[bsz:2 * bsz, 0:1]               # (B, 1) i32
    tid = ints_ref[2 * bsz:3 * bsz, 0:1]              # (B, 1) i32

    tint = tpack_ref[0:bsz, 0:s]                      # (B, S) f32
    interval_w = tpack_ref[bsz:bsz + 1, :]            # (1, HP) f32
    times = tpack_ref[2 * bsz:2 * bsz + (k + 1) * bsz, :]   # (ROWS, HP) f32

    # ---------------- encoder (p_model.calculate_logits state) ----------------
    pos = jax.lax.broadcasted_iota(jnp.int32, (bsz, s), 1)
    lens_f = jnp.maximum(lens_i, 1).astype(jnp.float32)        # guard len >= 1
    scale = jnp.where(pos < lens_i, 1.0 / lens_f, 0.0)         # (B,S) mask/len

    # masked-mean gather as a (B,N) count-matrix matmul; one select builds the
    # masked + length-normalized one-hot in a single VPU pass
    item_iota = jax.lax.broadcasted_iota(jnp.int32, (bsz, s, n_items), 2)
    onehot = jnp.where(item_iota == ids[:, :, None], scale[:, :, None], 0.0)
    count_mat = jnp.sum(onehot, axis=1)                        # (B, N)

    seq_repr = jnp.dot(count_mat, item_emb_ref[...],
                       preferred_element_type=jnp.float32)     # (B, HP)  MXU #1
    mean_interval = jnp.sum(tint * scale, axis=1, keepdims=True)   # (B, 1)
    seq_repr = seq_repr + mean_interval * interval_w           # (B, HP), cols>=H stay 0

    # ---------------- all K+1 logit blocks in ONE fused MXU op ----------------
    rows = (k + 1) * bsz
    lhs = jnp.broadcast_to(seq_repr[None, :, :], (k + 1, bsz, hp)).reshape(rows, hp)
    lhs = lhs + times                                          # time value at col H
    relu_big = jnp.maximum(
        jnp.dot(lhs, w_ref[...], preferred_element_type=jnp.float32), 0.0)  # (ROWS,N)

    # ---------------- loss -----------------------------------------------------
    # negative term: only sum_b(neg_b) is needed -> reduce straight to a scalar
    neg_total = jnp.sum(relu_big[:k * bsz, :])                 # scalar

    # target term: rows k*B.. are relu(logits(target_time)); gather via one-hot
    tgt_relu = relu_big[k * bsz:, :]                           # (B, N)
    col_ids = jax.lax.broadcasted_iota(jnp.int32, (bsz, n), 1)
    tgt = jnp.sum(jnp.where(col_ids == tid, tgt_relu, 0.0),
                  axis=1, keepdims=True)                       # (B, 1)
    ll_sum = jnp.sum(jnp.log(tgt + 1.0))                       # scalar

    # loss = -mean_b( log(tgt_b+1) - neg_b ) = (sum_b neg_b - sum_b log(tgt_b+1)) / B
    out_ref[0, 0] = (neg_total - ll_sum) / float(bsz)


@jax.jit
def mll_loss_pallas(item_emb, interval_w, w, time_w, item_seq, item_seq_len,
                    time_interval_seq, sampled_times, target_time, target_id):
    # Alignment invariants: the (K+1,B,HP)->(ROWS,HP) reshape and the row-k*B
    # slices are layout-free only if these hold.
    assert B % 8 == 0 and N_ITEMS % 128 == 0 and ((K + 1) * B) % 8 == 0 and (K * B) % 8 == 0

    # --- weights, augmented so base + time logits become ONE matmul ----------
    item_emb_aug = jnp.pad(item_emb, ((0, 0), (0, HP - H)))            # (N, HP)
    w_aug = jnp.concatenate(
        [w, time_w, jnp.zeros((HP - H - 1, N_ITEMS), jnp.float32)], axis=0)  # (HP, N)

    # --- packed f32 side input ------------------------------------------------
    t_stack = jnp.concatenate([sampled_times.T.reshape(-1), target_time], axis=0)  # (ROWS,)
    times_aug = jnp.pad(t_stack[:, None], ((0, 0), (H, HP - H - 1)))   # (ROWS, HP)
    interval_aug = jnp.pad(interval_w, ((0, 0), (0, HP - H)))          # (1, HP)
    tpack = jnp.zeros((2 * B + ROWS, HP), jnp.float32)
    tpack = tpack.at[0:B, 0:S].set(time_interval_seq)
    tpack = tpack.at[B:B + 1, :].set(interval_aug)
    tpack = tpack.at[2 * B:, :].set(times_aug)

    # --- packed i32 side input ------------------------------------------------
    ints = jnp.zeros((3 * B, S), jnp.int32)
    ints = ints.at[0:B, :].set(item_seq.astype(jnp.int32))
    ints = ints.at[B:2 * B, 0].set(item_seq_len.astype(jnp.int32))
    ints = ints.at[2 * B:3 * B, 0].set(target_id.reshape(-1).astype(jnp.int32))

    kernel = functools.partial(mll_kernel, k=K, s=S)
    vmem = pl.BlockSpec(memory_space=pltpu.MemorySpace.VMEM)
    out = pl.pallas_call(
        kernel,
        out_shape=jax.ShapeDtypeStruct((1, 1), jnp.float32),
        in_specs=[vmem, vmem, vmem, vmem],
        out_specs=pl.BlockSpec(memory_space=pltpu.MemorySpace.SMEM),
    )(item_emb_aug, w_aug, tpack, ints)
    return out[0, 0]


# ----------------------- plain-JAX reference (for checking) ------------------
def reference_loss(item_emb, interval_w, w, time_w, item_seq, item_seq_len,
                   time_interval_seq, sampled_times, target_time, target_id):
    emb = item_emb[item_seq]                                           # (B, S, H)
    pos = jnp.arange(S)[None, :]
    mask = (pos < item_seq_len[:, None]).astype(jnp.float32)           # (B, S)
    lens = item_seq_len.astype(jnp.float32)[:, None]                   # (B, 1)
    seq_repr = (emb * mask[..., None]).sum(axis=1) / lens              # (B, H)
    mean_interval = (time_interval_seq * mask).sum(axis=1, keepdims=True) / lens
    seq_repr = seq_repr + mean_interval * interval_w                   # (B, H)

    base = seq_repr @ w                                                # (B, N)
    neg = jnp.zeros((B,), jnp.float32)
    for i in range(K):
        neg = neg + jax.nn.relu(base + sampled_times[:, i:i + 1] * time_w).sum(axis=1)
    tl = jax.nn.relu(base + target_time[:, None] * time_w)
    one_hot = jax.nn.one_hot(target_id[:, 0], N_ITEMS, dtype=jnp.float32)
    tgt = (tl * one_hot).sum(axis=1)
    return -jnp.mean(jnp.log(tgt + 1.0) - neg)


# ------------------------------------ main -----------------------------------
if __name__ == "__main__":
    key = jax.random.PRNGKey(0)
    keys = jax.random.split(key, 10)

    # deterministic "parameters" of the synthetic p_model
    item_emb = jax.random.normal(keys[0], (N_ITEMS, H), jnp.float32) * 0.1
    w = jax.random.normal(keys[1], (H, N_ITEMS), jnp.float32) * 0.1
    time_w = jax.random.normal(keys[2], (1, N_ITEMS), jnp.float32) * 0.05
    interval_w = jax.random.normal(keys[3], (1, H), jnp.float32) * 0.05

    # deterministic inputs
    item_seq = jax.random.randint(keys[4], (B, S), 1, N_ITEMS, dtype=jnp.int32)
    item_seq_len = jax.random.randint(keys[5], (B,), 1, S + 1, dtype=jnp.int32)
    time_seq = jnp.cumsum(jax.random.uniform(keys[6], (B, S), jnp.float32), axis=1)
    time_interval_seq = jnp.concatenate(
        [jnp.zeros((B, 1), jnp.float32), jnp.diff(time_seq, axis=1)], axis=1)
    target_id = jax.random.randint(keys[7], (B, 1), 0, N_ITEMS, dtype=jnp.int32)

    # last_time = gather(time_seq, item_seq_len - 1)  (glue, as in the PyTorch code)
    last_time = jnp.take_along_axis(
        time_seq, (item_seq_len - 1)[:, None], axis=1)[:, 0]           # (B,)
    target_time = last_time + 1.0 + jax.random.uniform(keys[8], (B,), jnp.float32)

    # sampled_times = last_time + (target_time - last_time) * rand(1, k)
    # (torch.rand in forward is mirrored with jax.random here)
    sampled_nums = jax.random.uniform(keys[9], (1, K), jnp.float32)
    sampled_times = last_time[:, None] + (target_time - last_time)[:, None] * sampled_nums

    loss = jax.block_until_ready(
        mll_loss_pallas(item_emb, interval_w, w, time_w, item_seq, item_seq_len,
                        time_interval_seq, sampled_times, target_time, target_id))
    ref = reference_loss(item_emb, interval_w, w, time_w, item_seq, item_seq_len,
                         time_interval_seq, sampled_times, target_time, target_id)

    assert jnp.isfinite(loss), "loss is not finite"
    assert jnp.allclose(loss, ref, rtol=1e-3, atol=1e-3), (loss, ref)
    print("KERNEL_OK")
</pallas_src>

<mosaic_0001>
module attributes {stable_mosaic.version = 11 : i64} {
  func.func @mll_kernel(%arg0: memref<128x40xf32, #tpu.memory_space<vmem>>, %arg1: memref<40x128xf32, #tpu.memory_space<vmem>>, %arg2: memref<104x40xf32, #tpu.memory_space<vmem>>, %arg3: memref<24x8xi32, #tpu.memory_space<vmem>>, %arg4: memref<1x1xf32, #tpu.memory_space<smem>>) attributes {dimension_semantics = [], scalar_prefetch = 0 : i64, scratch_operands = 0 : i64, tpu.core_type = #tpu.core_type<tc>} {
    %c0 = arith.constant 0 : index
    %c0_0 = arith.constant 0 : index
    %0 = vector.load %arg3[%c0, %c0_0] : memref<24x8xi32, #tpu.memory_space<vmem>>, vector<8x8xi32>
    %c8 = arith.constant 8 : index
    %c0_1 = arith.constant 0 : index
    %1 = vector.load %arg3[%c8, %c0_1] : memref<24x8xi32, #tpu.memory_space<vmem>>, vector<8x1xi32>
    %c16 = arith.constant 16 : index
    %c0_2 = arith.constant 0 : index
    %2 = vector.load %arg3[%c16, %c0_2] : memref<24x8xi32, #tpu.memory_space<vmem>>, vector<8x1xi32>
    %c0_3 = arith.constant 0 : index
    %c0_4 = arith.constant 0 : index
    %3 = vector.load %arg2[%c0_3, %c0_4] : memref<104x40xf32, #tpu.memory_space<vmem>>, vector<8x8xf32>
    %c8_5 = arith.constant 8 : index
    %c0_6 = arith.constant 0 : index
    %4 = vector.load %arg2[%c8_5, %c0_6] : memref<104x40xf32, #tpu.memory_space<vmem>>, vector<1x40xf32>
    %c16_7 = arith.constant 16 : index
    %c0_8 = arith.constant 0 : index
    %5 = vector.load %arg2[%c16_7, %c0_8] : memref<104x40xf32, #tpu.memory_space<vmem>>, vector<88x40xf32>
    %6 = tpu.iota {dimensions = array<i32: 1>} : vector<8x8xi32>
    %c1_i32 = arith.constant 1 : i32
    %7 = vector.broadcast %c1_i32 : i32 to vector<8x1xi32>
    %8 = arith.maxsi %1, %7 : vector<8x1xi32>
    %9 = arith.sitofp %8 : vector<8x1xi32> to vector<8x1xf32>
    %10 = vector.broadcast %1 : vector<8x1xi32> to vector<8x8xi32>
    %11 = arith.cmpi slt, %6, %10 : vector<8x8xi32>
    %cst = arith.constant 1.000000e+00 : f32
    %12 = vector.broadcast %cst : f32 to vector<8x1xf32>
    %13 = arith.divf %12, %9 : vector<8x1xf32>
    %cst_9 = arith.constant 0.000000e+00 : f32
    %14 = vector.shape_cast %13 : vector<8x1xf32> to vector<8x1xf32>
    %15 = vector.broadcast %14 : vector<8x1xf32> to vector<8x8xf32>
    %16 = vector.broadcast %cst_9 : f32 to vector<8x8xf32>
    %17 = arith.select %11, %15, %16 : vector<8x8xi1>, vector<8x8xf32>
    %18 = tpu.iota {dimensions = array<i32: 2>} : vector<8x8x128xi32>
    %19 = vector.shape_cast %0 : vector<8x8xi32> to vector<8x8x1xi32>
    %20 = vector.broadcast %19 : vector<8x8x1xi32> to vector<8x8x128xi32>
    %21 = arith.cmpi eq, %18, %20 : vector<8x8x128xi32>
    %22 = vector.shape_cast %17 : vector<8x8xf32> to vector<8x8x1xf32>
    %cst_10 = arith.constant 0.000000e+00 : f32
    %23 = vector.shape_cast %22 : vector<8x8x1xf32> to vector<8x8x1xf32>
    %24 = vector.broadcast %23 : vector<8x8x1xf32> to vector<8x8x128xf32>
    %25 = vector.broadcast %cst_10 : f32 to vector<8x8x128xf32>
    %26 = arith.select %21, %24, %25 : vector<8x8x128xi1>, vector<8x8x128xf32>
    %cst_11 = arith.constant dense<0.000000e+00> : vector<8x128xf32>
    %27 = vector.multi_reduction <add>, %26, %cst_11 [1] : vector<8x8x128xf32> to vector<8x128xf32>
    %c0_12 = arith.constant 0 : index
    %c0_13 = arith.constant 0 : index
    %28 = vector.load %arg0[%c0_12, %c0_13] : memref<128x40xf32, #tpu.memory_space<vmem>>, vector<128x40xf32>
    %cst_14 = arith.constant dense<0.000000e+00> : vector<8x40xf32>
    %29 = tpu.matmul %27, %28, %cst_14 {dimension_numbers = #tpu.dot_dimension_numbers<[1], [0], [0], [1], [0, 0, 1, 1], [], []>} : vector<8x128xf32>, vector<128x40xf32>, vector<8x40xf32> -> vector<8x40xf32>
    %30 = arith.mulf %3, %17 : vector<8x8xf32>
    %cst_15 = arith.constant dense<0.000000e+00> : vector<8xf32>
    %31 = vector.multi_reduction <add>, %30, %cst_15 [1] : vector<8x8xf32> to vector<8xf32>
    %32 = vector.shape_cast %31 : vector<8xf32> to vector<8x1xf32>
    %33 = vector.broadcast %32 : vector<8x1xf32> to vector<8x40xf32>
    %34 = vector.broadcast %4 : vector<1x40xf32> to vector<8x40xf32>
    %35 = arith.mulf %33, %34 : vector<8x40xf32>
    %36 = arith.addf %29, %35 : vector<8x40xf32>
    %37 = vector.shape_cast %36 : vector<8x40xf32> to vector<1x8x40xf32>
    %38 = vector.shape_cast %37 : vector<1x8x40xf32> to vector<1x8x40xf32>
    %39 = vector.broadcast %38 : vector<1x8x40xf32> to vector<11x8x40xf32>
    %40 = vector.shape_cast %39 : vector<11x8x40xf32> to vector<88x40xf32>
    %41 = arith.addf %40, %5 : vector<88x40xf32>
    %c0_16 = arith.constant 0 : index
    %c0_17 = arith.constant 0 : index
    %42 = vector.load %arg1[%c0_16, %c0_17] : memref<40x128xf32, #tpu.memory_space<vmem>>, vector<40x128xf32>
    %cst_18 = arith.constant dense<0.000000e+00> : vector<88x128xf32>
    %43 = tpu.matmul %41, %42, %cst_18 {dimension_numbers = #tpu.dot_dimension_numbers<[1], [0], [0], [1], [0, 0, 1, 1], [], []>} : vector<88x40xf32>, vector<40x128xf32>, vector<88x128xf32> -> vector<88x128xf32>
    %cst_19 = arith.constant 0.000000e+00 : f32
    %44 = vector.broadcast %cst_19 : f32 to vector<88x128xf32>
    %45 = arith.maximumf %43, %44 : vector<88x128xf32>
    %46 = vector.extract_strided_slice %45 {offsets = [0, 0], sizes = [80, 128], strides = [1, 1]} : vector<88x128xf32> to vector<80x128xf32>
    %47 = vector.shape_cast %46 : vector<80x128xf32> to vector<1x80x128xf32>
    %cst_20 = arith.constant dense<0.000000e+00> : vector<1xf32>
    %48 = vector.multi_reduction <add>, %47, %cst_20 [1, 2] : vector<1x80x128xf32> to vector<1xf32>
    %49 = vector.shape_cast %48 : vector<1xf32> to vector<1x1x1xf32>
    %50 = vector.extract %49[0, 0, 0] : f32 from vector<1x1x1xf32>
    %51 = vector.extract_strided_slice %45 {offsets = [80, 0], sizes = [8, 128], strides = [1, 1]} : vector<88x128xf32> to vector<8x128xf32>
    %52 = tpu.iota {dimensions = array<i32: 1>} : vector<8x128xi32>
    %53 = vector.broadcast %2 : vector<8x1xi32> to vector<8x128xi32>
    %54 = arith.cmpi eq, %52, %53 : vector<8x128xi32>
    %cst_21 = arith.constant 0.000000e+00 : f32
    %55 = vector.broadcast %cst_21 : f32 to vector<8x128xf32>
    %56 = arith.select %54, %51, %55 : vector<8x128xi1>, vector<8x128xf32>
    %cst_22 = arith.constant dense<0.000000e+00> : vector<8xf32>
    %57 = vector.multi_reduction <add>, %56, %cst_22 [1] : vector<8x128xf32> to vector<8xf32>
    %58 = vector.shape_cast %57 : vector<8xf32> to vector<8x1xf32>
    %cst_23 = arith.constant 1.000000e+00 : f32
    %59 = vector.broadcast %cst_23 : f32 to vector<8x1xf32>
    %60 = arith.addf %58, %59 : vector<8x1xf32>
    %61 = math.log %60 : vector<8x1xf32>
    %62 = vector.shape_cast %61 : vector<8x1xf32> to vector<1x8x1xf32>
    %cst_24 = arith.constant dense<0.000000e+00> : vector<1xf32>
    %63 = vector.multi_reduction <add>, %62, %cst_24 [1, 2] : vector<1x8x1xf32> to vector<1xf32>
    %64 = vector.shape_cast %63 : vector<1xf32> to vector<1x1x1xf32>
    %65 = vector.extract %64[0, 0, 0] : f32 from vector<1x1x1xf32>
    %66 = arith.subf %50, %65 : f32
    %cst_25 = arith.constant 8.000000e+00 : f32
    %67 = arith.divf %66, %cst_25 : f32
    %c0_26 = arith.constant 0 : index
    %c0_27 = arith.constant 0 : index
    %68 = memref.load %arg4[%c0_26, %c0_27] : memref<1x1xf32, #tpu.memory_space<smem>>
    memref.store %67, %arg4[%c0_26, %c0_27] : memref<1x1xf32, #tpu.memory_space<smem>>
    return
  }
}

</mosaic_0001>

<bundles_post_ra>
// kernel: mll_loss_pallas.1
= control target key start
LH: loop header
LB: loop body
LE: loop exit
PB: predicated region body
PF: predicated region fallthrough
CT: control target
= control target key end

     0   :  { %v34_v1 = vlaneseq  ;;  %s999_s0 = inlined_call_operand.vmem [shape: f32[128,40], index: 0, kind: input, shape index: {}]   ;;  %s1000_s1 = inlined_call_operand.vmem [shape: f32[40,128], index: 1, kind: input, shape index: {}]   ;;  %s1001_s2 = inlined_call_operand.vmem [shape: f32[104,40], index: 2, kind: input, shape index: {}]   ;;  %s1002_s3 = inlined_call_operand.vmem [shape: s32[24,8], index: 3, kind: input, shape index: {}]   ;;  %s1003_s4 = inlined_call_operand.hbm [shape: f32[1,1], index: 4, kind: output, shape index: {}]  }
   0x1   :  { %v19_v0 = vld [vmem:[%s1002_s3 + $0x8] sm:$0xff] }
   0x2   :  { %9 = vsyncpa [#allocation3], 0  ;;  %v771_v2 = vmov 0   ;;  %vm36_vm0 = vcmp.gt.s32.totalorder %v19_v0, 1  ;;  %v804_v4 = vshrl.u32 %v34_v1, 7  ;;  %v18_v6 = vld [vmem:[%s1002_s3] sm:$0xff] }
   0x3   :  { %753 = vset.pattern.permute.xlu0 %v771_v2  ;;  %754 = vset.pattern.permute.xlu1 %v771_v2  ;;  %v37_v3 = vsel %vm36_vm0, %v19_v0, 1  ;;  %v227_v25 = vld [vmem:[%s999_s0] sm:$0xff]  ;;  %v228_v26 = vld [vmem:[%s999_s0 + $0x8] sm:$0xff]  ;;  %v823_v28 = vand.u32 127, %v34_v1  ;;  %v772_v29 = vmov 0.0|0.0   ;;  %v229_v30 = vld [vmem:[%s999_s0 + $0x10] sm:$0xff] }
   0x4   :  { %40 = vperm.xlu0 %753, %v19_v0   ;;  %v38_v5 = vcvt.s32.f32 %v37_v3  ;;  %v53_v7 = vsub.s32 0, %v804_v4  ;;  %v60_v8 = vsub.s32 1, %v804_v4  ;;  %v74_v11 = vsub.s32 3, %v804_v4  ;;  %708 = vmatprep.subr.bf16.mxu0 %v772_v29  ;;  %v230_v31 = vld [vmem:[%s999_s0 + $0x18] sm:$0xff]  ;;  %v231_v37 = vld [vmem:[%s999_s0 + $0x20] sm:$0xff]  ;;  %v232_v38 = vld [vmem:[%s999_s0 + $0x28] sm:$0xff] }
   0x5   :  { %v81_v13 = vsub.s32 4, %v804_v4  ;;  %v67_v14 = vsub.s32 2, %v804_v4  ;;  %v88_v17 = vsub.s32 5, %v804_v4  ;;  %v102_v19 = vsub.s32 7, %v804_v4  ;;  %738 = vmatprep.subr.bf16.mxu1 %v772_v29  ;;  %v233_v41 = vld [vmem:[%s999_s0 + $0x30] sm:$0xff]  ;;  %v234_v42 = vld [vmem:[%s999_s0 + $0x38] sm:$0xff] }
   0x6   :  { %755 = vrcp.f32 %v38_v5  ;;  %v54_v9 = vrot.slane %v18_v6, %v53_v7  ;;  %v61_v10 = vrot.slane %v18_v6, %v60_v8  ;;  %v75_v12 = vrot.slane %v18_v6, %v74_v11  ;;  %v235_v46 = vld [vmem:[%s999_s0 + $0x40] sm:$0xff]  ;;  %v236_v47 = vld [vmem:[%s999_s0 + $0x48] sm:$0xff]  ;;  %v237_v50 = vld [vmem:[%s999_s0 + $0x50] sm:$0xff]  ;;  %s759_s12 = scalar_lea.hbm %s1003_s4, 16 }
   0x7   :  { %v82_v16 = vrot.slane %v18_v6, %v81_v13  ;;  %v68_v18 = vrot.slane %v18_v6, %v67_v14  ;;  %v89_v20 = vrot.slane %v18_v6, %v88_v17  ;;  %v95_v21 = vsub.s32 6, %v804_v4  ;;  %v238_v51 = vld [vmem:[%s999_s0 + $0x58] sm:$0xff]  ;;  %v239_v54 = vld [vmem:[%s999_s0 + $0x60] sm:$0xff]  ;;  %v240_v55 = vld [vmem:[%s999_s0 + $0x68] sm:$0xff]  ;;  %p760_p0 = scmp.ne.s32.totalorder %s1003_s4, %s759_s12  ;;  %p763_p1 = scmp.lt.u32.totalorder %s759_s12, %s1003_s4 }
   0x8   :  { %56 = vbcast.lane.b32.xlu1 %v54_v9, 256  ;;  %v103_v22 = vrot.slane %v18_v6, %v102_v19  ;;  %v709_v27 = vpack.c.bf16 %v228_v26, %v227_v25  ;;  %v712_v32 = vpack.c.bf16 %v230_v31, %v229_v30  ;;  %v715_v39 = vpack.c.bf16 %v232_v38, %v231_v37  ;;  %v241_v58 = vld [vmem:[%s999_s0 + $0x70] sm:$0xff]  ;;  %v242_v59 = vld [vmem:[%s999_s0 + $0x78] sm:$0xff]  ;;  %v21_v62 = vld [vmem:[%s1001_s2] sm:$0xff] }
   0x9   :  { %v96_v23 = vrot.slane %v18_v6, %v95_v21  ;;  %v718_v43 = vpack.c.bf16 %v234_v42, %v233_v41  ;;  %v721_v48 = vpack.c.bf16 %v236_v47, %v235_v46  ;;  %v724_v52 = vpack.c.bf16 %v238_v51, %v237_v50  ;;  %v357_v1 = vld [vmem:[%s1000_s1] sm:$0xff]  ;;  %v358_v2 = vld [vmem:[%s1000_s1 + $0x8] sm:$0xff]  ;;  %p765_p2 = pnand %p763_p1, %p760_p0 }
   0xa   :  { %710 = vmatpush3.bf16.msra.mxu0 %v709_v27  ;;  %v727_v56 = vpack.c.bf16 %v240_v55, %v239_v54  ;;  %v730_v60 = vpack.c.bf16 %v242_v59, %v241_v58  ;;  %vm773_vm2 = vmmov 0   ;;  %v774_v61 = vmov 0.0  }
   0xb   :  { %711 = vmatprep.subr.bf16.mxu0 %v772_v29  ;;  %662 = vmatprep.mubr.msk.f32.mxu0 %vm773_vm2, %v774_v61  ;;  %vm244_vm3 = vcmask 64512   ;;  %v891_v3 = vpack.c.bf16 %v358_v2, %v357_v1  ;;  %vm261_vm12 = vcmask 1041409   ;;  %vm263_vm13 = vcmask 1042434  }
   0xc   :  { %63 = vbcast.lane.b32.xlu1 %v61_v10, 256  ;;  %678 = vmatprep.mubr.msk.f32.mxu1 %vm773_vm2, %v774_v61  ;;  %vm265_vm14 = vcmask 1043459   ;;  %vm267_vm15 = vcmask 1044484   ;;  %vm269_vm0 = vcmask 1045509  }
   0xd   :  { %741 = vmatpush3.bf16.msra.mxu1 %v891_v3 }
   0xe   :  { %713 = vmatpush3.bf16.msra.mxu0 %v712_v32  ;;  %739 = vmatprep.subr.bf16.mxu1 %v772_v29 }
   0xf   :  { %714 = vmatprep.subr.bf16.mxu0 %v772_v29 }
  0x10   :  { %v756_v15 = vpop.eup %755  ;;  %77 = vbcast.lane.b32.xlu1 %v75_v12, 256 }
  0x11   :  { %47 = vperm.xlu0 %753, %v756_v15  }
  0x12   :  { %716 = vmatpush3.bf16.msra.mxu0 %v715_v39 }
  0x13   :  { %717 = vmatprep.subr.bf16.mxu0 %v772_v29 }
  0x14   :  { %84 = vbcast.lane.b32.xlu1 %v82_v16, 256 }
  0x15   :  { %70 = vbcast.lane.b32.xlu0 %v68_v18, 256 }
  0x16   :  { %719 = vmatpush3.bf16.msra.mxu0 %v718_v43 }
  0x17   :  { %720 = vmatprep.subr.bf16.mxu0 %v772_v29 }
  0x18   :  { %91 = vbcast.lane.b32.xlu1 %v89_v20, 256 }
  0x1a   :  { %722 = vmatpush3.bf16.msra.mxu0 %v721_v48 }
  0x1b   :  { %723 = vmatprep.subr.bf16.mxu0 %v772_v29 }
  0x1c   :  { %98 = vbcast.lane.b32.xlu1 %v96_v23, 256 }
  0x1e   :  { %725 = vmatpush3.bf16.msra.mxu0 %v724_v52 }
  0x1f   :  { %726 = vmatprep.subr.bf16.mxu0 %v772_v29 }
  0x22   :  { %728 = vmatpush3.bf16.msra.mxu0 %v727_v56 }
  0x23   :  { %729 = vmatprep.subr.bf16.mxu0 %v772_v29 }
  0x26   :  { %731 = vmatpush3.bf16.msra.mxu0 %v730_v60 }
  0x27   :  { %732 = vmatprep.subr.bf16.mxu0 %v772_v29 }
  0x7a   :  { %v57_v4 = vpop.permute.xlu1 %56 }
  0x7b   :  { %vm107_vm4 = vcmp.eq.s32.totalorder %v823_v28, %v57_v4 }
  0x7e   :  { %v64_v5 = vpop.permute.xlu1 %63 }
  0x7f   :  { %vm108_vm5 = vcmp.eq.s32.totalorder %v823_v28, %v64_v5 }
  0x82   :  { %v78_v6 = vpop.permute.xlu1 %77 }
  0x83   :  { %v41_v24 = vpop.permute.xlu0 %40  ;;  %vm110_vm8 = vcmp.eq.s32.totalorder %v823_v28, %v78_v6 }
  0x84   :  { %vm42_vm1 = vcmp.lt.s32.totalorder %v823_v28, %v41_v24 }
  0x90   :  { %v48_v33 = vpop.permute.xlu0 %47 }
  0x91   :  { %v50_v34 = vsel %vm42_vm1, %v48_v33, 0.0  ;;  %vm271_vm1 = vcmask 1046534  }
  0x92   :  { %v125_v35 = vrot.slane %v50_v34, %v60_v8  ;;  %v118_v36 = vrot.slane %v50_v34, %v53_v7  ;;  %v132_v40 = vrot.slane %v50_v34, %v67_v14  ;;  %v139_v44 = vrot.slane %v50_v34, %v74_v11  ;;  %v85_v7 = vpop.permute.xlu1 %84 }
  0x93   :  { %v167_v45 = vrot.slane %v50_v34, %v102_v19  ;;  %v146_v49 = vrot.slane %v50_v34, %v81_v13  ;;  %v153_v53 = vrot.slane %v50_v34, %v88_v17  ;;  %v160_v57 = vrot.slane %v50_v34, %v95_v21 }
  0x94   :  { %127 = vbcast.lane.b32.xlu0 %v125_v35, 256  ;;  %120 = vbcast.lane.b32.xlu1 %v118_v36, 256  ;;  %v243_v63 = vmul.f32 %v50_v34, %v21_v62  ;;  %v71_v9 = vpop.permute.xlu0 %70  ;;  %vm111_vm9 = vcmp.eq.s32.totalorder %v823_v28, %v85_v7 }
  0x95   :  { %vm109_vm6 = vcmp.eq.s32.totalorder %v823_v28, %v71_v9 }
  0x96   :  { %v245_v0 = vsel %vm244_vm3, %v243_v63, 0.0  ;;  %v92_v8 = vpop.permute.xlu1 %91  ;;  %vm273_vm3 = vcmask 1047559  }
  0x97   :  { %vm112_vm10 = vcmp.eq.s32.totalorder %v823_v28, %v92_v8 }
  0x98   :  { %134 = vbcast.lane.b32.xlu0 %v132_v40, 256  ;;  %105 = vbcast.lane.b32.xlu1 %v103_v22, 256 }
  0x9a   :  { %v99_v10 = vpop.permute.xlu1 %98 }
  0x9b   :  { %vm113_vm11 = vcmp.eq.s32.totalorder %v823_v28, %v99_v10 }
  0x9c   :  { %141 = vbcast.lane.b32.xlu0 %v139_v44, 256  ;;  %169 = vbcast.lane.b32.xlu1 %v167_v45, 256 }
  0xa0   :  { %148 = vbcast.lane.b32.xlu0 %v146_v49, 256 }
  0xa4   :  { %155 = vbcast.lane.b32.xlu0 %v153_v53, 256 }
  0xa8   :  { %162 = vbcast.lane.b32.xlu0 %v160_v57, 256 }
  0xc7   :  { %246 = vadd.xlane.f32.xlu0 %v245_v0 }
 0x106   :  { %v128_v11 = vpop.permute.xlu0 %127  ;;  %v121_v12 = vpop.permute.xlu1 %120 }
 0x107   :  { %v172_v13 = vsel %vm108_vm5, %v128_v11, 0.0  ;;  %v171_v14 = vsel %vm107_vm4, %v121_v12, 0.0  ;;  %vm362_vm4 = vcmask 326656   ;;  %vm555_vm5 = vcmask 7168  }
 0x108   :  { %v185_v17 = vrot.slane %v172_v13, 4  ;;  %v179_v18 = vrot.slane %v171_v14, 4 }
 0x10a   :  { %v135_v15 = vpop.permute.xlu0 %134  ;;  %v106_v16 = vpop.permute.xlu1 %105  ;;  %v186_v23 = vadd.f32 %v185_v17, %v172_v13  ;;  %v180_v24 = vadd.f32 %v179_v18, %v171_v14 }
 0x10b   :  { %v173_v19 = vsel %vm109_vm6, %v135_v15, 0.0  ;;  %vm114_vm7 = vcmp.eq.s32.totalorder %v823_v28, %v106_v16 }
 0x10c   :  { %v191_v20 = vrot.slane %v173_v19, 4  ;;  %v187_v33 = vrot.slane %v186_v23, 2  ;;  %v181_v34 = vrot.slane %v180_v24, 2 }
 0x10e   :  { %v142_v21 = vpop.permute.xlu0 %141  ;;  %v170_v22 = vpop.permute.xlu1 %169  ;;  %v192_v26 = vadd.f32 %v191_v20, %v173_v19  ;;  %v188_v42 = vadd.f32 %v187_v33, %v186_v23  ;;  %v182_v43 = vadd.f32 %v181_v34, %v180_v24  ;;  %v359_v23 = vld [vmem:[%s1000_s1 + $0x10] sm:$0xff]  ;;  %v360_v24 = vld [vmem:[%s1000_s1 + $0x18] sm:$0xff] }
 0x10f   :  { %v174_v25 = vsel %vm110_vm8, %v142_v21, 0.0  ;;  %v178_v30 = vsel %vm114_vm7, %v170_v22, 0.0  ;;  %v24_v33 = vld [vmem:[%s1001_s2 + $0x18] sm:$0xff] }
 0x110   :  { %v197_v27 = vrot.slane %v174_v25, 4  ;;  %v221_v35 = vrot.slane %v178_v30, 4  ;;  %v193_v37 = vrot.slane %v192_v26, 2  ;;  %v189_v53 = vrot.slane %v188_v42, 1 }
 0x111   :  { %v183_v54 = vrot.slane %v182_v43, 1 }
 0x112   :  { %v198_v31 = vadd.f32 %v197_v27, %v174_v25  ;;  %v149_v32 = vpop.permute.xlu0 %148  ;;  %v222_v44 = vadd.f32 %v221_v35, %v178_v30  ;;  %v194_v46 = vadd.f32 %v193_v37, %v192_v26  ;;  %v190_v1 = vadd.f32 %v189_v53, %v188_v42  ;;  %v585_v26 = vld [vmem:[%s1001_s2 + $0x8] ss:$0 sm:$0xff]  ;;  %v27_v42 = vld [vmem:[%s1001_s2 + $0x30] sm:$0xff] }
 0x113   :  { %v175_v36 = vsel %vm111_vm9, %v149_v32, 0.0  ;;  %v184_v2 = vadd.f32 %v183_v54, %v182_v43  ;;  %v736_v25 = vpack.c.bf16 %v360_v24, %v359_v23  ;;  %v23_v32 = vld [vmem:[%s1001_s2 + $0x10] sm:$0xff]  ;;  %v33_v54 = vld [vmem:[%s1001_s2 + $0x60] sm:$0xff] }
 0x114   :  { %v203_v38 = vrot.slane %v175_v36, 4  ;;  %v199_v39 = vrot.slane %v198_v31, 2  ;;  %v223_v55 = vrot.slane %v222_v44, 2  ;;  %v195_v57 = vrot.slane %v194_v46, 1 }
 0x115   :  { %v262_v11 = vsel %vm261_vm12, %v190_v1, %v184_v2  ;;  %742 = vmatpush3.bf16.msra.mxu1 %v736_v25 }
 0x116   :  { %v204_v40 = vadd.f32 %v203_v38, %v175_v36  ;;  %v156_v41 = vpop.permute.xlu0 %155  ;;  %v200_v49 = vadd.f32 %v199_v39, %v198_v31  ;;  %v224_v4 = vadd.f32 %v223_v55, %v222_v44  ;;  %v196_v5 = vadd.f32 %v195_v57, %v194_v46  ;;  %740 = vmatprep.subr.mxu1 %v774_v61  ;;  %v25_v38 = vld [vmem:[%s1001_s2 + $0x20] sm:$0xff]  ;;  %v28_v44 = vld [vmem:[%s1001_s2 + $0x38] sm:$0xff] }
 0x117   :  { %v176_v45 = vsel %vm112_vm10, %v156_v41, 0.0  ;;  %v29_v46 = vld [vmem:[%s1001_s2 + $0x40] sm:$0xff] }
 0x118   :  { %v205_v47 = vrot.slane %v204_v40, 2  ;;  %v209_v48 = vrot.slane %v176_v45, 4  ;;  %v201_v60 = vrot.slane %v200_v49, 1  ;;  %v225_v12 = vrot.slane %v224_v4, 1 }
 0x119   :  { %v264_v14 = vsel %vm263_vm13, %v196_v5, %v262_v11 }
 0x11a   :  { %v206_v50 = vadd.f32 %v205_v47, %v204_v40  ;;  %v210_v51 = vadd.f32 %v209_v48, %v176_v45  ;;  %v163_v52 = vpop.permute.xlu0 %162  ;;  %v202_v8 = vadd.f32 %v201_v60, %v200_v49  ;;  %v226_v19 = vadd.f32 %v225_v12, %v224_v4  ;;  %v26_v40 = vld [vmem:[%s1001_s2 + $0x28] sm:$0xff] }
 0x11b   :  { %v177_v56 = vsel %vm113_vm11, %v163_v52, 0.0  ;;  %v30_v48 = vld [vmem:[%s1001_s2 + $0x48] sm:$0xff]  ;;  %v32_v52 = vld [vmem:[%s1001_s2 + $0x58] sm:$0xff] }
 0x11c   :  { %v211_v58 = vrot.slane %v210_v51, 2  ;;  %v215_v59 = vrot.slane %v177_v56, 4  ;;  %v207_v62 = vrot.slane %v206_v50, 1  ;;  %v266_v16 = vsel %vm265_vm14, %v202_v8, %v264_v14 }
 0x11e   :  { %v212_v63 = vadd.f32 %v211_v58, %v210_v51  ;;  %v216_v0 = vadd.f32 %v215_v59, %v177_v56  ;;  %v208_v9 = vadd.f32 %v207_v62, %v206_v50  ;;  %v31_v50 = vld [vmem:[%s1001_s2 + $0x50] sm:$0xff] }
 0x120   :  { %v213_v6 = vrot.slane %v212_v63, 1  ;;  %v217_v7 = vrot.slane %v216_v0, 2  ;;  %v268_v18 = vsel %vm267_vm15, %v208_v9, %v266_v16 }
 0x122   :  { %v218_v10 = vadd.f32 %v217_v7, %v216_v0  ;;  %v214_v13 = vadd.f32 %v213_v6, %v212_v63 }
 0x124   :  { %v219_v15 = vrot.slane %v218_v10, 1  ;;  %v270_v20 = vsel %vm269_vm0, %v214_v13, %v268_v18 }
 0x126   :  { %v220_v17 = vadd.f32 %v219_v15, %v218_v10 }
 0x128   :  { %v272_v21 = vsel %vm271_vm1, %v220_v17, %v270_v20 }
 0x129   :  { %v274_v22 = vsel %vm273_vm3, %v226_v19, %v272_v21 }
 0x12a   :  { %663 = vmatmul.mubr.f32.vlgmr.msra.gmra.mrb[0].mxu0 %v274_v22 }
 0x12b   :  { %734 = vmatpush3.bf16.msra.mxu0 %v891_v3  ;;  %675 = vmatprep.mubr.msk.f32.mxu0 %vm773_vm2, %v774_v61  ;;  %v361_v3 = vld [vmem:[%s1000_s1 + $0x20] sm:$0xff] }
 0x12c   :  { %735 = vmatprep.subr.bf16.mxu0 %v772_v29  ;;  %743 = vmatpush3.msra.mxu1 %v361_v3  ;;  %v20_v29 = vld [vmem:[%s1002_s3 + $0x10] sm:$0xff] }
 0x12d   :  { %546 = vperm.xlu1 %754, %v20_v29  }
 0x12f   :  { %737 = vmatpush3.bf16.msra.mxu0 %v736_v25 }
 0x130   :  { %673 = vmatprep.subr.mxu0 %v774_v61 }
 0x133   :  { %674 = vmatpush3.msra.mxu0 %v361_v3 }
 0x154   :  { %v247_v27 = vpop.xlane.xlu0 %246 }
 0x155   :  { %v252_v30 = vmul.f32 %v585_v26, %v247_v27 }
 0x1fd   :  { %v342_v31 = vpop.f32.mrb[0].mxu0 }
 0x1fe   :  { %v343_v34 = vadd.f32 %v342_v31, %v252_v30  ;;  %v664_v35 = vpop.f32.mrb[1].mxu0  ;;  %v547_v31 = vpop.permute.xlu1 %546 }
 0x200   :  { %v346_v36 = vadd.f32 %v343_v34, %v23_v32  ;;  %v347_v37 = vadd.f32 %v343_v34, %v24_v33  ;;  %v348_v39 = vadd.f32 %v343_v34, %v25_v38  ;;  %v349_v41 = vadd.f32 %v343_v34, %v26_v40 }
 0x201   :  { %v350_v43 = vadd.f32 %v343_v34, %v27_v42  ;;  %v351_v45 = vadd.f32 %v343_v34, %v28_v44  ;;  %v352_v47 = vadd.f32 %v343_v34, %v29_v46  ;;  %v353_v49 = vadd.f32 %v343_v34, %v30_v48 }
 0x202   :  { %676 = vmatmul.mubr.msk.f32.vlgmr.msra.gmra.mrb[2].mxu0 %vm362_vm4, %v346_v36  ;;  %679 = vmatmul.mubr.msk.f32.vlgmr.msra.gmra.mrb[0].mxu1 %vm362_vm4, %v347_v37  ;;  %v354_v51 = vadd.f32 %v343_v34, %v31_v50  ;;  %v355_v53 = vadd.f32 %v343_v34, %v32_v52  ;;  %v356_v55 = vadd.f32 %v343_v34, %v33_v54 }
 0x203   :  { %681 = vmatprep.mubr.msk.f32.mxu1 %vm773_vm2, %v774_v61 }
 0x206   :  { %682 = vmatmul.mubr.msk.f32.gmra.mrb[2].mxu1 %vm362_vm4, %v348_v39 }
 0x207   :  { %684 = vmatprep.mubr.msk.f32.mxu1 %vm773_vm2, %v774_v61 }
 0x20a   :  { %685 = vmatmul.mubr.msk.f32.gmra.mrb[4].mxu1 %vm362_vm4, %v349_v41 }
 0x20b   :  { %687 = vmatprep.mubr.msk.f32.mxu1 %vm773_vm2, %v774_v61 }
 0x20e   :  { %688 = vmatmul.mubr.msk.f32.gmra.mrb[6].mxu1 %vm362_vm4, %v350_v43 }
 0x20f   :  { %690 = vmatprep.mubr.msk.f32.mxu1 %vm773_vm2, %v774_v61 }
 0x212   :  { %691 = vmatmul.mubr.msk.f32.gmra.mrb[8].mxu1 %vm362_vm4, %v351_v45 }
 0x213   :  { %693 = vmatprep.mubr.msk.f32.mxu1 %vm773_vm2, %v774_v61 }
 0x216   :  { %694 = vmatmul.mubr.msk.f32.gmra.mrb[10].mxu1 %vm362_vm4, %v352_v47 }
 0x217   :  { %696 = vmatprep.mubr.msk.f32.mxu1 %vm773_vm2, %v774_v61 }
 0x21a   :  { %697 = vmatmul.mubr.msk.f32.gmra.mrb[12].mxu1 %vm362_vm4, %v353_v49 }
 0x21b   :  { %699 = vmatprep.mubr.msk.f32.mxu1 %vm773_vm2, %v774_v61 }
 0x21e   :  { %700 = vmatmul.mubr.msk.f32.gmra.mrb[14].mxu1 %vm362_vm4, %v354_v51 }
 0x21f   :  { %702 = vmatprep.mubr.msk.f32.mxu1 %vm773_vm2, %v774_v61 }
 0x222   :  { %703 = vmatmul.mubr.msk.f32.gmra.mrb[16].mxu1 %vm362_vm4, %v355_v53 }
 0x223   :  { %705 = vmatprep.mubr.msk.f32.mxu1 %vm773_vm2, %v774_v61  ;;  %vm548_vm2 = vcmp.eq.s32.totalorder %v823_v28, %v547_v31 }
 0x226   :  { %706 = vmatmul.mubr.msk.f32.gmra.mrb[18].mxu1 %vm362_vm4, %v356_v55 }
 0x2d5   :  { %v462_v56 = vpop.f32.mrb[2].mxu0  ;;  %v467_v57 = vpop.f32.mrb[0].mxu1 }
 0x2d6   :  { %v516_v58 = vmax.f32 %v462_v56, 0.0  ;;  %v517_v59 = vmax.f32 %v467_v57, 0.0  ;;  %v677_v60 = vpop.f32.mrb[3].mxu0  ;;  %v680_v62 = vpop.f32.mrb[1].mxu1 }
 0x2d8   :  { %v527_v63 = vadd.f32 %v517_v59, %v516_v58 }
 0x2d9   :  { %v472_v0 = vpop.f32.mrb[2].mxu1 }
 0x2da   :  { %v518_v1 = vmax.f32 %v472_v0, 0.0  ;;  %v683_v2 = vpop.f32.mrb[3].mxu1 }
 0x2dc   :  { %v528_v4 = vadd.f32 %v527_v63, %v518_v1 }
 0x2dd   :  { %v477_v5 = vpop.f32.mrb[4].mxu1 }
 0x2de   :  { %v519_v6 = vmax.f32 %v477_v5, 0.0  ;;  %v686_v7 = vpop.f32.mrb[5].mxu1 }
 0x2e0   :  { %v529_v8 = vadd.f32 %v528_v4, %v519_v6 }
 0x2e1   :  { %v482_v9 = vpop.f32.mrb[6].mxu1 }
 0x2e2   :  { %v520_v61 = vmax.f32 %v482_v9, 0.0  ;;  %v689_v10 = vpop.f32.mrb[7].mxu1 }
 0x2e4   :  { %v530_v11 = vadd.f32 %v529_v8, %v520_v61 }
 0x2e5   :  { %v487_v12 = vpop.f32.mrb[8].mxu1 }
 0x2e6   :  { %v521_v13 = vmax.f32 %v487_v12, 0.0  ;;  %v692_v14 = vpop.f32.mrb[9].mxu1 }
 0x2e8   :  { %v531_v15 = vadd.f32 %v530_v11, %v521_v13 }
 0x2e9   :  { %v492_v16 = vpop.f32.mrb[10].mxu1 }
 0x2ea   :  { %v522_v17 = vmax.f32 %v492_v16, 0.0  ;;  %v695_v18 = vpop.f32.mrb[11].mxu1 }
 0x2ec   :  { %v532_v19 = vadd.f32 %v531_v15, %v522_v17 }
 0x2ed   :  { %v497_v20 = vpop.f32.mrb[12].mxu1 }
 0x2ee   :  { %v523_v21 = vmax.f32 %v497_v20, 0.0  ;;  %v698_v22 = vpop.f32.mrb[13].mxu1 }
 0x2f0   :  { %v533_v23 = vadd.f32 %v532_v19, %v523_v21 }
 0x2f1   :  { %v502_v24 = vpop.f32.mrb[14].mxu1 }
 0x2f2   :  { %v524_v25 = vmax.f32 %v502_v24, 0.0  ;;  %v701_v3 = vpop.f32.mrb[15].mxu1 }
 0x2f4   :  { %v534_v29 = vadd.f32 %v533_v23, %v524_v25 }
 0x2f5   :  { %v507_v26 = vpop.f32.mrb[16].mxu1 }
 0x2f6   :  { %v525_v27 = vmax.f32 %v507_v26, 0.0  ;;  %v704_v30 = vpop.f32.mrb[17].mxu1 }
 0x2f8   :  { %v535_v32 = vadd.f32 %v534_v29, %v525_v27 }
 0x2f9   :  { %v512_v33 = vpop.f32.mrb[18].mxu1 }
 0x2fa   :  { %v526_v34 = vmax.f32 %v512_v33, 0.0  ;;  %v707_v35 = vpop.f32.mrb[19].mxu1  ;;  %536 = vadd.xlane.f32.xlu0 %v535_v32 }
 0x2fc   :  { %v549_v36 = vsel %vm548_vm2, %v526_v34, 0.0 }
 0x2fd   :  { %550 = vadd.xlane.f32.xlu1 %v549_v36 }
 0x387   :  { %v537_v37 = vpop.xlane.xlu0 %536 }
 0x388   :  { %v538_v38 = vrot.slane %v537_v37, 4 }
 0x38a   :  { %v539_v39 = vadd.f32 %v538_v38, %v537_v37  ;;  %v551_v40 = vpop.xlane.xlu1 %550 }
 0x38b   :  { %v552_v41 = vadd.f32 1.0, %v551_v40 }
 0x38c   :  { %v540_v42 = vrot.slane %v539_v39, 2 }
 0x38d   :  { %757 = vlog2.f32 %v552_v41 }
 0x38e   :  { %v541_v43 = vadd.f32 %v540_v42, %v539_v39 }
 0x390   :  { %v542_v44 = vrot.slane %v541_v43, 1 }
 0x392   :  { %v543_v45 = vadd.f32 %v542_v44, %v541_v43 }
 0x394   :  { %744 = vpush %v543_v45 }
 0x397   :  { %v758_v46 = vpop.eup %757 }
 0x398   :  { %v554_v47 = vmul.f32 0.6931472, %v758_v46 }
 0x39a   :  { %v556_v28 = vsel %vm555_vm5, %v554_v47, 0.0 }
 0x39b   :  { %557 = vadd.xlane.f32.xlu0 %v556_v28 }
 0x3c5   :  { %s745_s2 = spop %744 }
 0x428   :  { %v558_v48 = vpop.xlane.xlu0 %557 }
 0x429   :  { %v559_v49 = vrot.slane %v558_v48, 4 }
 0x42b   :  { %v560_v50 = vadd.f32 %v559_v49, %v558_v48 }
 0x42d   :  { %v561_v51 = vrot.slane %v560_v50, 2 }
 0x42f   :  { %v562_v52 = vadd.f32 %v561_v51, %v560_v50 }
 0x431   :  { %v563_v53 = vrot.slane %v562_v52, 1 }
 0x433   :  { %v564_v54 = vadd.f32 %v563_v53, %v562_v52 }
 0x435   :  { %746 = vpush %v564_v54 }
 0x466   :  { %s747_s7 = spop %746 }
 0x467   :  { %s566_s8 = ssub.f32 %s745_s2, %s747_s7 }
 0x469   :  { %s569_s9 = smul.f32 0.125, %s566_s8 }
 0x46b   :  { %571 = sst [smem:[#allocation2]] %s569_s9 }
 0x46c   :  { %768 = shalt.err (!%p765_p2)
}
 0x46d   :  { %s775_s1 = smov [#allocation2]  }
 0x46e   :  { %579 = dma.smem_to_hbm %s775_s1, 16, %s1003_s4, [#allocation3]  }
 0x46f   :  { %769 = dma.done.wait [#allocation3], 16  }
 0x470   :  { %770 = vsyncadd [#allocation3], 4294967280 }
 0x471   :  { %583 = sfence }
 0x472   :  { %584 = vsyncpa [#allocation3], 1 }

</bundles_post_ra>
